<compile_context>
chip_gen: v6e
topology: v6e:2x2x1
jax: 0.10.0
libtpu: 0.0.40
codegen_flags: <defaults>
</compile_context>

<pallas_src>
import functools

import jax
import jax.numpy as jnp
from jax.experimental import pallas as pl
from jax.experimental.pallas import tpu as pltpu

_NUM_ELEMENTS = 118
_W_LANES = 128  # 118 padded up to one full lane register


# ---------------------------------------------------------------------------
# Pallas kernel: fused one-hot lookup + per-graph segment sum + linear (no bias)
# ---------------------------------------------------------------------------
def _ref_energy_kernel(types_ref, starts_ref, ends_ref, w_ref, out_ref):
    """One grid step = one tile of atoms accumulated into this split's output row."""
    @pl.when(pl.program_id(1) == 0)
    def _():
        out_ref[...] = jnp.zeros_like(out_ref)

    types = types_ref[...]                       # (tile_n, 1) int32 atomic numbers
    starts = starts_ref[...]                     # (1, b_pad) int32 per-graph start offsets
    ends = ends_ref[...]                         # (1, b_pad) int32 per-graph end offsets
    w = w_ref[...]                               # (1, 128)  f32 zero-padded weight row

    tile_n = types.shape[0]
    b_pad = out_ref.shape[-1]

    # Per-atom reference energy e_i = w[type_i]: lane-iota compare + select
    # (no int->f32 convert, no multiply), then a lane reduce.
    lane = jax.lax.broadcasted_iota(jnp.int32, (tile_n, _W_LANES), 1)
    e = jnp.sum(jnp.where(types == lane, w, 0.0), axis=-1, keepdims=True)   # (tile_n, 1)

    # Global atom index of each row in this tile (splits are laid out
    # contiguously: split c owns atoms [c*steps*tile_n, (c+1)*steps*tile_n)).
    base = (pl.program_id(0) * pl.num_programs(1) + pl.program_id(1)) * tile_n
    g_idx = base + jax.lax.broadcasted_iota(jnp.int32, (tile_n, 1), 0)      # (tile_n, 1)

    # Graph membership via contiguous [start, end) intervals.  Padded tail
    # atoms (g_idx >= N) and padded graphs (start == end == 0) match nothing,
    # so they contribute exactly zero regardless of their (padded) type value.
    mask = (g_idx >= starts) & (g_idx < ends)                               # (tile_n, b_pad)
    contrib = jnp.sum(jnp.where(mask, e, 0.0), axis=0, keepdims=True)       # (1, b_pad)
    out_ref[0:1, :] += contrib


def linear_reference_energy_pallas(atom_types, n_node, weight, *,
                                   tile_n=4096, num_splits=2):
    """Forward pass. `weight` has torch nn.Linear(118, 1, bias=False) layout: (1, 118)."""
    N = int(atom_types.shape[0])
    B = int(n_node.shape[0])
    b_pad = ((B + 127) // 128) * 128  # lane-dense accumulator width

    # Tile size: big (amortizes ~0.35 us/grid-step overhead), capped so the f32
    # intermediates tile_n*(128 + b_pad)*4 B stay <= ~8 MiB (safe under the
    # scoped-VMEM defaults of v5e/v6e/v7x without flags), and shrunk for tiny N.
    cap = (8 * 1024 * 1024) // ((_W_LANES + b_pad) * 4)
    tile = max(8, min(tile_n, (cap // 8) * 8))
    per_split = -(-N // num_splits)
    tile = min(tile, max(8, ((per_split + 7) // 8) * 8))

    steps = -(-N // (num_splits * tile))
    n_padded = num_splits * steps * tile

    # Lane-dense, zero-padded weight row: (1, 118) -> (1, 128).
    w_pad = jnp.pad(weight.astype(jnp.float32).reshape(1, _NUM_ELEMENTS),
                    ((0, 0), (0, _W_LANES - _NUM_ELEMENTS)))

    # Per-graph contiguous [start, end) offsets; padded graphs get an empty
    # interval (0, 0) so they never match.
    nn = n_node.astype(jnp.int32)
    ends = jnp.cumsum(nn)
    starts = ends - nn
    starts_p = jnp.pad(starts, (0, b_pad - B)).reshape(1, b_pad)
    ends_p = jnp.pad(ends, (0, b_pad - B)).reshape(1, b_pad)

    # Only the tiny int32 atom-type vector is padded; padded tail values are
    # irrelevant because the in-kernel [start, end) mask excludes them.
    types_p = jnp.pad(atom_types.astype(jnp.int32), (0, n_padded - N)).reshape(-1, 1)

    out = pl.pallas_call(
        _ref_energy_kernel,
        out_shape=jax.ShapeDtypeStruct((num_splits * 8, b_pad), jnp.float32),
        grid_spec=pltpu.PrefetchScalarGridSpec(
            num_scalar_prefetch=0,
            grid=(num_splits, steps),
            in_specs=[
                pl.BlockSpec((tile, 1), lambda c, i, s=steps: (c * s + i, 0)),  # atom types
                pl.BlockSpec((1, b_pad), lambda c, i: (0, 0)),                  # graph starts
                pl.BlockSpec((1, b_pad), lambda c, i: (0, 0)),                  # graph ends
                pl.BlockSpec((1, _W_LANES), lambda c, i: (0, 0)),               # weight row
            ],
            out_specs=pl.BlockSpec((8, b_pad), lambda c, i: (c, 0)),
        ),
        compiler_params=pltpu.CompilerParams(
            # Axis 0 splits independent atom ranges (megacore on v7x, serial
            # elsewhere); axis 1 is the in-split reduction -> "arbitrary".
            dimension_semantics=("parallel", "arbitrary")),
    )(types_p, starts_p, ends_p, w_pad)

    # Only row 0 of each split's 8-row output block is non-zero; summing all
    # rows combines the per-split partial sums.
    return out.sum(axis=0)[:B].reshape(B, 1)


# ---------------------------------------------------------------------------
# Module wrapper mirroring the PyTorch LinearReferenceEnergy
# ---------------------------------------------------------------------------
class LinearReferenceEnergyPallas:
    """Linear reference energy (no bias term) — Pallas forward pass."""

    def __init__(self, weight_init=None, trainable=None, key=None):
        if weight_init is not None:
            self.weight = jnp.asarray(weight_init, jnp.float32).reshape(1, _NUM_ELEMENTS)
        else:
            bound = 1.0 / float(_NUM_ELEMENTS) ** 0.5  # torch nn.Linear default init
            self.weight = jax.random.uniform(
                key, (1, _NUM_ELEMENTS), jnp.float32, -bound, bound)
        # TODO(synk): `trainable` only toggles requires_grad in PyTorch; it has no
        # effect on the forward pass and is ignored here.

    def __call__(self, atom_types, n_node):
        return linear_reference_energy_pallas(atom_types, n_node, self.weight)


# ---------------------------------------------------------------------------
# Demo / self-check
# ---------------------------------------------------------------------------
if __name__ == "__main__":
    key = jax.random.PRNGKey(0)
    k_types, k_w = jax.random.split(key)

    # Small synthetic batch: 2 graphs with 7 + 9 = 16 atoms.
    B = 2
    n_node = jnp.array([7, 9], dtype=jnp.int32)
    N = 16
    atom_types = jax.random.randint(k_types, (N,), 0, _NUM_ELEMENTS, dtype=jnp.int32)
    weight_init = 0.1 * jax.random.normal(k_w, (1, _NUM_ELEMENTS), jnp.float32)

    model = LinearReferenceEnergyPallas(weight_init=weight_init)
    pred = model(atom_types, n_node)
    jax.block_until_ready(pred)
    assert pred.shape == (B, 1)

    # Plain-JAX reference: one-hot -> per-graph segment sum -> Linear(118, 1, no bias).
    one_hot = jax.nn.one_hot(atom_types, _NUM_ELEMENTS, dtype=jnp.float32)
    seg_ids = jnp.repeat(jnp.arange(B), n_node, total_repeat_length=N)
    reduced = jax.ops.segment_sum(one_hot, seg_ids, num_segments=B)
    ref = reduced @ weight_init.T
    assert jnp.allclose(pred, ref, atol=1e-5, rtol=1e-5), (pred, ref)

    print("KERNEL_OK")
</pallas_src>

<mosaic_0001>
module attributes {stable_mosaic.version = 11 : i64} {
  func.func @_ref_energy_kernel(%arg0: i32, %arg1: i32, %arg2: memref<8x1xi32, #tpu.memory_space<vmem>>, %arg3: memref<1x128xi32, #tpu.memory_space<vmem>>, %arg4: memref<1x128xi32, #tpu.memory_space<vmem>>, %arg5: memref<1x128xf32, #tpu.memory_space<vmem>>, %arg6: memref<8x128xf32, #tpu.memory_space<vmem>>) attributes {dimension_semantics = [#tpu.dimension_semantics<parallel>, #tpu.dimension_semantics<arbitrary>], iteration_bounds = array<i64: 2, 1>, scalar_prefetch = 0 : i64, scratch_operands = 0 : i64, tpu.core_type = #tpu.core_type<tc>, window_params = [{transform_indices = @transform_0, window_bounds = array<i64: 8, 1>}, {pipeline_mode = #tpu.pipeline_mode<synchronous>, transform_indices = @transform_1, window_bounds = array<i64: 1, 128>}, {pipeline_mode = #tpu.pipeline_mode<synchronous>, transform_indices = @transform_2, window_bounds = array<i64: 1, 128>}, {pipeline_mode = #tpu.pipeline_mode<synchronous>, transform_indices = @transform_3, window_bounds = array<i64: 1, 128>}, {transform_indices = @transform_4, window_bounds = array<i64: 8, 128>}]} {
    %c0_i32 = arith.constant 0 : i32
    %0 = arith.cmpi eq, %arg1, %c0_i32 : i32
    %1 = arith.extui %0 : i1 to i32
    %c0_i32_0 = arith.constant 0 : i32
    %2 = arith.cmpi ne, %1, %c0_i32_0 : i32
    scf.if %2 {
      %cst_15 = arith.constant 0.000000e+00 : f32
      %38 = vector.broadcast %cst_15 : f32 to vector<8x128xf32>
      %c0_16 = arith.constant 0 : index
      %c0_17 = arith.constant 0 : index
      %39 = vector.load %arg6[%c0_16, %c0_17] : memref<8x128xf32, #tpu.memory_space<vmem>>, vector<8x128xf32>
      tpu.vector_store %arg6[%c0_16, %c0_17], %38 {strides = array<i32>} : memref<8x128xf32, #tpu.memory_space<vmem>>, vector<8x128xf32>,
    } else {
    }
    %c0 = arith.constant 0 : index
    %c0_1 = arith.constant 0 : index
    %3 = vector.load %arg2[%c0, %c0_1] : memref<8x1xi32, #tpu.memory_space<vmem>>, vector<8x1xi32>
    %c0_2 = arith.constant 0 : index
    %c0_3 = arith.constant 0 : index
    %4 = vector.load %arg3[%c0_2, %c0_3] : memref<1x128xi32, #tpu.memory_space<vmem>>, vector<1x128xi32>
    %c0_4 = arith.constant 0 : index
    %c0_5 = arith.constant 0 : index
    %5 = vector.load %arg4[%c0_4, %c0_5] : memref<1x128xi32, #tpu.memory_space<vmem>>, vector<1x128xi32>
    %c0_6 = arith.constant 0 : index
    %c0_7 = arith.constant 0 : index
    %6 = vector.load %arg5[%c0_6, %c0_7] : memref<1x128xf32, #tpu.memory_space<vmem>>, vector<1x128xf32>
    %7 = tpu.iota {dimensions = array<i32: 1>} : vector<8x128xi32>
    %8 = vector.broadcast %3 : vector<8x1xi32> to vector<8x128xi32>
    %9 = arith.cmpi eq, %8, %7 : vector<8x128xi32>
    %cst = arith.constant 0.000000e+00 : f32
    %10 = vector.shape_cast %6 : vector<1x128xf32> to vector<1x128xf32>
    %11 = vector.broadcast %10 : vector<1x128xf32> to vector<8x128xf32>
    %12 = vector.broadcast %cst : f32 to vector<8x128xf32>
    %13 = arith.select %9, %11, %12 : vector<8x128xi1>, vector<8x128xf32>
    %cst_8 = arith.constant dense<0.000000e+00> : vector<8xf32>
    %14 = vector.multi_reduction <add>, %13, %cst_8 [1] : vector<8x128xf32> to vector<8xf32>
    %15 = vector.shape_cast %14 : vector<8xf32> to vector<8x1xf32>
    %c1_i32 = arith.constant 1 : i32
    %16 = arith.muli %arg0, %c1_i32 : i32
    %17 = arith.addi %16, %arg1 : i32
    %c8_i32 = arith.constant 8 : i32
    %18 = arith.muli %17, %c8_i32 : i32
    %19 = tpu.iota {dimensions = array<i32: 0>} : vector<8x1xi32>
    %20 = vector.broadcast %18 : i32 to vector<8x1xi32>
    %21 = arith.addi %20, %19 : vector<8x1xi32>
    %22 = vector.broadcast %21 : vector<8x1xi32> to vector<8x128xi32>
    %23 = vector.broadcast %4 : vector<1x128xi32> to vector<8x128xi32>
    %24 = arith.cmpi sge, %22, %23 : vector<8x128xi32>
    %25 = vector.broadcast %21 : vector<8x1xi32> to vector<8x128xi32>
    %26 = vector.broadcast %5 : vector<1x128xi32> to vector<8x128xi32>
    %27 = arith.cmpi slt, %25, %26 : vector<8x128xi32>
    %28 = arith.andi %24, %27 : vector<8x128xi1>
    %cst_9 = arith.constant 0.000000e+00 : f32
    %29 = vector.shape_cast %15 : vector<8x1xf32> to vector<8x1xf32>
    %30 = vector.broadcast %29 : vector<8x1xf32> to vector<8x128xf32>
    %31 = vector.broadcast %cst_9 : f32 to vector<8x128xf32>
    %32 = arith.select %28, %30, %31 : vector<8x128xi1>, vector<8x128xf32>
    %cst_10 = arith.constant dense<0.000000e+00> : vector<128xf32>
    %33 = vector.multi_reduction <add>, %32, %cst_10 [0] : vector<8x128xf32> to vector<128xf32>
    %34 = vector.shape_cast %33 : vector<128xf32> to vector<1x128xf32>
    %c0_11 = arith.constant 0 : index
    %c0_12 = arith.constant 0 : index
    %35 = vector.load %arg6[%c0_11, %c0_12] : memref<8x128xf32, #tpu.memory_space<vmem>>, vector<1x128xf32>
    %36 = arith.addf %35, %34 : vector<1x128xf32>
    %c0_13 = arith.constant 0 : index
    %c0_14 = arith.constant 0 : index
    %37 = vector.load %arg6[%c0_13, %c0_14] : memref<8x128xf32, #tpu.memory_space<vmem>>, vector<1x128xf32>
    tpu.vector_store %arg6[%c0_13, %c0_14], %36 {strides = array<i32>} : memref<8x128xf32, #tpu.memory_space<vmem>>, vector<1x128xf32>,
    return
  }
  func.func @transform_0(%arg0: i32, %arg1: i32) -> (i32, i32) {
    %c1_i32 = arith.constant 1 : i32
    %0 = arith.muli %arg0, %c1_i32 : i32
    %1 = arith.addi %0, %arg1 : i32
    %c0_i32 = arith.constant 0 : i32
    %c0_i32_0 = arith.constant 0 : i32
    return %1, %c0_i32 : i32, i32
  }
  func.func @transform_1(%arg0: i32, %arg1: i32) -> (i32, i32) {
    %c0_i32 = arith.constant 0 : i32
    %c0_i32_0 = arith.constant 0 : i32
    %c0_i32_1 = arith.constant 0 : i32
    return %c0_i32, %c0_i32_0 : i32, i32
  }
  func.func @transform_2(%arg0: i32, %arg1: i32) -> (i32, i32) {
    %c0_i32 = arith.constant 0 : i32
    %c0_i32_0 = arith.constant 0 : i32
    %c0_i32_1 = arith.constant 0 : i32
    return %c0_i32, %c0_i32_0 : i32, i32
  }
  func.func @transform_3(%arg0: i32, %arg1: i32) -> (i32, i32) {
    %c0_i32 = arith.constant 0 : i32
    %c0_i32_0 = arith.constant 0 : i32
    %c0_i32_1 = arith.constant 0 : i32
    return %c0_i32, %c0_i32_0 : i32, i32
  }
  func.func @transform_4(%arg0: i32, %arg1: i32) -> (i32, i32) {
    %c0_i32 = arith.constant 0 : i32
    %c0_i32_0 = arith.constant 0 : i32
    return %arg0, %c0_i32 : i32, i32
  }
}

</mosaic_0001>

<bundles_post_ra>
// kernel: tpu_custom_call.1
= control target key start
LH: loop header
LB: loop body
LE: loop exit
PB: predicated region body
PF: predicated region fallthrough
CT: control target
= control target key end

     0   :  { %9 = vsyncpa [#allocation3], 0  ;;  %s632_s0 = inlined_call_operand.vmem [shape: s32[16,1], index: 0, kind: input, shape index: {}]   ;;  %s633_s1 = inlined_call_operand.vmem [shape: s32[1,128], index: 1, kind: input, shape index: {}]   ;;  %s634_s2 = inlined_call_operand.vmem [shape: s32[1,128], index: 2, kind: input, shape index: {}]   ;;  %s635_s3 = inlined_call_operand.vmem [shape: f32[1,128], index: 3, kind: input, shape index: {}]   ;;  %s636_s4 = inlined_call_operand.hbm [shape: f32[16,128], index: 4, kind: output, shape index: {}]  }
   0x1   :  { %11 = vsyncpa [#allocation3 + $0x1], 0  ;;  %s523_s15 = smov 0   ;;  %s525_s16 = smov 0  }
   0x2   :  { %s527_s17 = smov 0   ;;  %s529_s18 = smov 0  }
   0x3   :  { %s531_s19 = smov 0   ;;  %s533_s20 = smov 0  }
   0x4 LB: > { %s344_s21 = sadd.s32 4294967295, %s493_s20   ;;  %s345_s22 = sadd.s32 4294967294, %s493_s20   ;;  %s493_s20 = sphi %s533_s20, %s17_s20   ;;  %s489_s19 = sphi %s531_s19, %s643_s19   ;;  %s485_s18 = sphi %s529_s18, %s642_s18   ;;  %s481_s17 = sphi %s527_s17, %s641_s17   ;;  %s477_s16 = sphi %s525_s16, %s640_s16   ;;  %s473_s15 = sphi %s523_s15, %s639_s15  }
   0x5   : > { %s29_s23 = sadd.s32 1, %s489_s19  ;;  %s127_s24 = sadd.s32 1, %s481_s17 }
   0x6   : > { %p31_p0 = scmp.ge.s32.totalorder %s29_s23, 2  ;;  %p137_p1 = scmp.ne.s32.totalorder %s481_s17, %s477_s16 }
   0x7   : > { %p138_p2 = scmp.eq.s32.totalorder %s344_s21, 1  ;;  %p143_p3 = scmp.ne.s32.totalorder %s477_s16, %s473_s15 }
   0x8   : > { %s645_s23 = smov (%p31_p0, %s29_s23), 0  ;;  %p144_p5 = scmp.eq.s32.totalorder %s345_s22, 1 }
   0x9   : > { %p563_p4 = por %p138_p2, %p137_p1  ;;  %s124_s26 = ssub.s32 %s489_s19, %s645_s23 }
   0xa   : > { %p348_p6 = scmp.ge.s32.totalorder %s493_s20, 1  ;;  %p125_p7 = scmp.eq.s32.totalorder %s124_s26, 0 }
   0xb   : > { %p570_p8 = por %p144_p5, %p143_p3  ;;  %p180_p9 = scmp.lt.s32.totalorder %s493_s20, 3 }
   0xc   : > { %s576_s28 = scalar_select %p125_p7, %s481_s17, %s127_s24  }
   0xd   : > { %p181_p10 = pnand %p348_p6, %p180_p9 }
   0xe   : > { %p207_p11 = scmp.lt.s32.totalorder (!%p181_p10), %s485_s18, 1  ;;  %s203_s10 = sand.u32 (!%p181_p10), 1, %s477_s16  }
   0xf   : > { %184 = sbr.rel (%p181_p10) target bundleno = 317 (0x13d), region = 36  ;;  %s349_s11 = sshll.u32 (!%p181_p10), %s203_s10, 3 }
  0x10   : > { %s205_s12 = scalar_lea.vmem (!%p181_p10), [#allocation2], %s349_s11  ;;  %s352_s13 = sshll.u32 (!%p181_p10), %s485_s18, 3 }
  0x11   : > { %s356_s26 = sshll.u32 (!%p181_p10), %s485_s18, 7  ;;  %s497_s9 = smov (!%p181_p10), [#allocation2]  }
  0x12   : > { %s275_s6 = scalar_lea.hbm (!%p181_p10), %s636_s4, %s356_s26  ;;  %s421_s11 = sshll.u32 (!%p181_p10), %s497_s9, 4  ;;  %s422_s11 = int_to_ptr.vmem [resolvable:$false] %s421_s11 }
  0x14   : > { %v495_v0 = vmov 0   ;;  %s208_s29 = scalar_select %p207_p11, %s485_s18, 1  ;;  %v221_v2 = vlaneseq  ;;  %v351_v4 = vld [vmem:[%s635_s3] ss:$0 sm:$0xff]  ;;  %v496_v7 = vmov 0.0   ;;  %v240_v9 = vstv %s352_s13 }
  0x15   : > { %416 = vset.pattern.permute.xlu0 %v495_v0  ;;  %216 = vst [vmem:[%s205_s12] sm:$0xff] %v496_v7  ;;  %v353_v11 = vld [vmem:[%s633_s1] ss:$0 sm:$0xff]  ;;  %s423_s13 = scalar_lea.vmem %s422_s11, 256 }
  0x16   : > { %s350_s30 = sshll.u32 %s208_s29, 3  ;;  %v222_v3 = vand.u32 127, %v221_v2  ;;  %v239_v8 = vshrl.u32 %v221_v2, 7  ;;  %v354_v12 = vld [vmem:[%s634_s2] ss:$0 sm:$0xff]  ;;  %s277_s29 = sshll.u32 %s205_s12, 4  ;;  %s278_s29 = int_to_ptr.vmem [resolvable:$true] %s277_s29 }
  0x17   : > { %s210_s7 = scalar_lea.vmem %s632_s0, %s350_s30  ;;  %s417_s8 = scalar_lea.vmem %s278_s29, 128 }
  0x18   : > { %v217_v1 = vld [vmem:[%s210_s7] sm:$0xff]  ;;  %v241_v10 = vadd.s32 %v240_v9, %v239_v8  ;;  %s264_s7 = scalar_lea.sflag [#allocation3], %s203_s10  ;;  %p418_p12 = scmp.ne.s32.totalorder %s278_s29, %s417_s8 }
  0x19   : > { %224 = vperm.xlu0 %416, %v217_v1   ;;  %p424_p1 = scmp.lt.s32.totalorder %s278_s29, %s422_s11  ;;  %p425_p2 = scmp.lt.s32.totalorder %s423_s13, %s417_s8 }
  0x1a   : > { %vm246_vm1 = vcmp.ge.s32.totalorder %v241_v10, %v353_v11  ;;  %vm251_vm2 = vcmp.lt.s32.totalorder %v241_v10, %v354_v12  ;;  %p419_p13 = pnand %p418_p12, %p563_p4 }
  0x1b   : > { %vm252_vm3 = vmand %vm246_vm1, %vm251_vm2  ;;  %p426_p3 = por %p425_p2, %p424_p1 }
  0x1c   : > { %v260_v20 = vld [vmem:[%s205_s12] sm:$0x1]  ;;  %p420_p0 = pneg %p419_p13 }
  0x1e   : > { %p427_p5 = pnand %p426_p3, %p420_p0 }
  0x94   : > { %v225_v5 = vpop.permute.xlu0 %224 }
  0x95   : > { %vm226_vm0 = vcmp.eq.s32.totalorder %v225_v5, %v222_v3 }
  0x96   : > { %v233_v6 = vsel %vm226_vm0, %v351_v4, 0.0 }
  0x97   : > { %234 = vadd.xlane.f32.xlu0 %v233_v6 }
 0x120   : > { %v235_v13 = vpop.xlane.xlu0 %234 }
 0x121   : > { %v253_v14 = vsel %vm252_vm3, %v235_v13, 0.0 }
 0x122   : > { %v254_v15 = vrot.slane %v253_v14, 4 }
 0x124   : > { %v255_v16 = vadd.f32 %v254_v15, %v253_v14 }
 0x126   : > { %v256_v17 = vrot.slane %v255_v16, 2 }
 0x128   : > { %v257_v18 = vadd.f32 %v256_v17, %v255_v16 }
 0x12a   : > { %v258_v19 = vrot.slane %v257_v18, 1 }
 0x12c   : > { %v259_v21 = vadd.f32 %v258_v19, %v257_v18 }
 0x12e   : > { %v261_v22 = vadd.f32 %v260_v20, %v259_v21 }
 0x130   : > { %262 = vst [vmem:[%s205_s12] sm:$0x1] %v261_v22 }
 0x131   : > { %430 = shalt.err (!%p427_p5)
}
 0x132   : > { %s431_s18 = scalar_lea.hbm %s275_s6, 128  ;;  %s435_s14 = scalar_lea.hbm %s636_s4, 256 }
 0x133   : > { %p432_p6 = scmp.ne.s32.totalorder %s275_s6, %s431_s18  ;;  %p436_p10 = scmp.lt.s32.totalorder %s275_s6, %s636_s4 }
 0x134   : > { %p437_p11 = scmp.lt.s32.totalorder %s435_s14, %s431_s18 }
 0x135   : > { %p433_p7 = pnand %p432_p6, %p563_p4 }
 0x136   : > { %p438_p12 = por %p437_p11, %p436_p10 }
 0x137   : > { %p434_p9 = pneg %p433_p7 }
 0x139   : > { %p439_p13 = pnand %p438_p12, %p434_p9 }
 0x13b   : > { %442 = shalt.err (!%p439_p13)
}
 0x13c   : > { %359 = dma.vmem_to_hbm [thread:$0]  (%p563_p4), %s278_s29, 128, %s275_s6, %s264_s7  }
 0x13d PF: > { %p365_p0 = scmp.ge.s32.totalorder %s493_s20, 2  ;;  %s289_s24 = sand.u32 1, %s473_s15  }
 0x13e   : > { %s290_s26 = scalar_lea.sflag [#allocation3], %s289_s24 }
 0x13f   : > { %p362_p1 = pnand %p365_p0, %p570_p8 }
 0x141   : > { %p363_p2 = pneg %p362_p1 }
 0x143   : > { %468 = dma.done.wait (%p363_p2), %s290_s26, 128  }
 0x144   : > { %470 = vsyncadd (%p363_p2), %s290_s26, 4294967168  ;;  %s17_s20 = sadd.s32 1, %s493_s20   ;;  %s639_s15 = smov %s477_s16 }
 0x145   : > { %p14_p3 = scmp.ge.s32.totalorder %s17_s20, 4   ;;  %s640_s16 = smov %s481_s17 }
 0x146   : > { %s641_s17 = smov %s576_s28  ;;  %s642_s18 = smov %s489_s19 }
 0x147   : > { %s643_s19 = smov %s645_s23  ;;  %16 = sbr.rel (!%p14_p3) target bundleno = 4 (0x4), region = 75 }
 0x14c   :  { %295 = vsyncpa [#allocation3], 1 }
 0x14d   :  { %297 = vsyncpa [#allocation3 + $0x1], 1 }

</bundles_post_ra>
